<compile_context>
chip_gen: v7x
topology: tpu7x:2x2x1
jax: 0.10.0
libtpu: 0.0.40
codegen_flags: <defaults>
</compile_context>

<pallas_src>
import functools

import jax
import jax.numpy as jnp
import numpy as np
from jax.experimental import pallas as pl
from jax.experimental.pallas import tpu as pltpu


def _node_ae_loss_kernel(tags_ref, labels_ref, push_ref, pull_ref, *,
                         batch_size, max_persons, loss_type, lane_chunk):
    B, P = batch_size, max_persons
    BP = B * P
    T = tags_ref.shape[1]
    num_chunks = T // lane_chunk          # wrapper pads T to a multiple of lane_chunk

    # ---- per-(image, person) count / sum / sum-of-squares: lane-axis reductions -------
    # One combined slot key  b*P + p  selects membership; everything stays lane-dense.
    slot_iota = jax.lax.broadcasted_iota(jnp.int32, (BP, lane_chunk), 0)

    cnt = jnp.zeros((BP, 1), jnp.float32)
    ssum = jnp.zeros((BP, 1), jnp.float32)
    ssq = jnp.zeros((BP, 1), jnp.float32)
    # Statically unrolled; the dependency chain through (cnt, ssum, ssq) keeps only one
    # chunk's (BP, lane_chunk) temporaries live at a time.
    # TODO(synk): switch to lax.fori_loop(unroll=True) chunking if T grows to many thousands.
    for c in range(num_chunks):
        lo, hi = c * lane_chunk, (c + 1) * lane_chunk
        tg = tags_ref[:, lo:hi]                       # (1, chunk) f32
        person = labels_ref[0:1, lo:hi]               # (1, chunk) i32
        image = labels_ref[1:2, lo:hi]                # (1, chunk) i32
        key = image * P + person                      # (1, chunk) i32
        mask = key == slot_iota                       # (BP, chunk) bool
        masked_tags = jnp.where(mask, tg, 0.0)        # (BP, chunk) f32
        cnt = cnt + jnp.sum(jnp.where(mask, 1.0, 0.0), axis=1, keepdims=True)
        ssum = ssum + jnp.sum(masked_tags, axis=1, keepdims=True)
        ssq = ssq + jnp.sum(masked_tags * tg, axis=1, keepdims=True)

    inv_cnt = jnp.where(cnt > 0.0, 1.0 / cnt, 0.0)    # empty persons -> mean 0, pull 0
    means = ssum * inv_cnt                            # (BP, 1)
    # per-person pull = mean((x - mean)^2) = E[x^2] - mean^2  (clamped for fp safety)
    pull_per = jnp.maximum(ssq * inv_cnt - means * means, 0.0)   # (BP, 1)

    # Row-layout means (1, BP) from the column means via a tiny masked sublane reduction
    # (avoids an in-kernel transpose / duplicated column inputs).
    r_iota = jax.lax.broadcasted_iota(jnp.int32, (BP, BP), 0)
    c_iota = jax.lax.broadcasted_iota(jnp.int32, (BP, BP), 1)
    means_row = jnp.sum(jnp.where(r_iota == c_iota, means, 0.0),
                        axis=0, keepdims=True)        # (1, BP)

    p_iota_col = jax.lax.broadcasted_iota(jnp.int32, (P, 1), 0)
    p_iota_row = jax.lax.broadcasted_iota(jnp.int32, (1, P), 1)

    # ---- per-image push / pull: tiny (P, P) blocks, B is small and static -------------
    for b in range(B):
        base = b * P
        cnt_b = cnt[base:base + P, :]                 # (P, 1)
        mean_col_b = means[base:base + P, :]          # (P, 1)
        mean_row_b = means_row[:, base:base + P]      # (1, P)
        pull_sum_b = jnp.sum(pull_per[base:base + P, :])

        # num_tags = (max person label present) + 1; 0 for an empty image.  Matches the
        # length of PyTorch's scatter_mean output (empty persons keep mean 0 and are
        # still counted, as in the reference module).
        num_tags = jnp.max(jnp.where(cnt_b > 0.0, p_iota_col + 1, 0))
        num_tags_f = num_tags.astype(jnp.float32)
        pull = pull_sum_b / jnp.maximum(num_tags_f, 1.0)

        diff = mean_row_b - mean_col_b                # (P, P): diff[i, j] = mean_j - mean_i
        if loss_type == "exp":
            terms = jnp.exp(-(diff * diff))
        elif loss_type == "max":
            terms = jnp.maximum(1.0 - jnp.abs(diff), 0.0)
        else:
            raise ValueError("Unknown ae loss type")
        pair_mask = (p_iota_col < num_tags) & (p_iota_row < num_tags)    # (P, P)
        push_sum = jnp.sum(jnp.where(pair_mask, terms, 0.0)) - num_tags_f
        denom = jnp.maximum((num_tags_f - 1.0) * num_tags_f, 1.0)
        push = jnp.where(num_tags >= 2, push_sum / denom * 0.5, 0.0)

        push_ref[b] = push
        pull_ref[b] = pull


def node_ae_loss(tags, person_label, batch_index, *, batch_size, max_persons,
                 loss_type="exp", lane_chunk=512):
    """Returns (pushes, pulls), each of shape (batch_size,), matching NodeAELoss.forward.

    Requires person_label in [0, max_persons) and batch_index in [0, batch_size).
    """
    T = tags.shape[0]
    assert person_label.shape == (T,) and batch_index.shape == (T,)

    # Pad the node axis to a lane-aligned multiple of the chunk.  Padded nodes get
    # batch index == batch_size, so they fall outside every (image, person) slot.
    t_pad = max((T + 127) // 128 * 128, 128)
    chunk = min(t_pad, max(lane_chunk // 128 * 128, 128))
    t_pad = (t_pad + chunk - 1) // chunk * chunk
    pad = t_pad - T

    tags_row = jnp.pad(tags.astype(jnp.float32), (0, pad)).reshape(1, t_pad)
    person_p = jnp.pad(person_label.astype(jnp.int32), (0, pad))
    batch_p = jnp.pad(batch_index.astype(jnp.int32), (0, pad),
                      constant_values=batch_size)
    labels = jnp.stack([person_p, batch_p], axis=0)    # (2, t_pad) int32

    kernel = functools.partial(_node_ae_loss_kernel, batch_size=batch_size,
                               max_persons=max_persons, loss_type=loss_type,
                               lane_chunk=chunk)

    pushes, pulls = pl.pallas_call(
        kernel,
        out_shape=(jax.ShapeDtypeStruct((batch_size,), jnp.float32),
                   jax.ShapeDtypeStruct((batch_size,), jnp.float32)),
        in_specs=[pl.BlockSpec(memory_space=pltpu.MemorySpace.VMEM),
                  pl.BlockSpec(memory_space=pltpu.MemorySpace.VMEM)],
        out_specs=(pl.BlockSpec(memory_space=pltpu.MemorySpace.SMEM),
                   pl.BlockSpec(memory_space=pltpu.MemorySpace.SMEM)),
    )(tags_row, labels)
    return pushes, pulls


def _ref_single(pred_tags, person_label, loss_type):
    """Numpy replica of NodeAELoss.singleTagLoss."""
    if person_label.size == 0:
        return 0.0, 0.0
    num_tags = int(person_label.max()) + 1
    means = np.zeros(num_tags, dtype=np.float64)
    pull_per = np.zeros(num_tags, dtype=np.float64)
    for p in range(num_tags):
        sel = person_label == p
        if sel.any():
            means[p] = pred_tags[sel].mean()
    for p in range(num_tags):
        sel = person_label == p
        if sel.any():
            pull_per[p] = ((pred_tags[sel] - means[p]) ** 2).mean()
    pull = pull_per.sum()
    if num_tags == 1:
        return 0.0, pull / num_tags
    A = np.broadcast_to(means, (num_tags, num_tags))   # A[i, j] = means[j]
    diff = A - A.T
    if loss_type == "exp":
        push = np.exp(-diff ** 2).sum() - num_tags
    elif loss_type == "max":
        push = np.clip(1.0 - np.abs(diff), 0.0, None).sum() - num_tags
    else:
        raise ValueError("Unknown ae loss type")
    return push / ((num_tags - 1) * num_tags) * 0.5, pull / num_tags


if __name__ == "__main__":
    key = jax.random.PRNGKey(0)
    k1, k2 = jax.random.split(key)

    B = 2          # images in the batch
    T = 128        # total graph nodes across the batch (lane-dense last dim)
    P = 6          # static upper bound on persons per image

    tags = jax.random.normal(k1, (T,), dtype=jnp.float32)
    batch_index = jnp.concatenate([
        jnp.zeros((T // 2,), jnp.int32),
        jnp.ones((T - T // 2,), jnp.int32),
    ])
    person_label = jax.random.randint(k2, (T,), 0, P, dtype=jnp.int32)
    # Give image 1 a different (smaller) number of persons to exercise the masking.
    person_label = jnp.where(batch_index == 1, person_label % 3, person_label)

    tags_np = np.asarray(tags, dtype=np.float64)
    person_np = np.asarray(person_label)
    batch_np = np.asarray(batch_index)

    for loss_type in ("exp", "max"):
        pushes, pulls = node_ae_loss(tags, person_label, batch_index,
                                     batch_size=B, max_persons=P, loss_type=loss_type)
        pushes, pulls = jax.block_until_ready((pushes, pulls))

        ref_push, ref_pull = [], []
        for b in range(B):
            sel = batch_np == b
            rp, rl = _ref_single(tags_np[sel], person_np[sel], loss_type)
            ref_push.append(rp)
            ref_pull.append(rl)
        ref_push = np.array(ref_push)
        ref_pull = np.array(ref_pull)

        assert pushes.shape == (B,) and pulls.shape == (B,)
        assert np.allclose(np.asarray(pushes), ref_push, atol=1e-5, rtol=1e-5), \
            (loss_type, pushes, ref_push)
        assert np.allclose(np.asarray(pulls), ref_pull, atol=1e-5, rtol=1e-5), \
            (loss_type, pulls, ref_pull)

    print("KERNEL_OK")
</pallas_src>

<mosaic_0001>
module attributes {stable_mosaic.version = 11 : i64} {
  func.func @_node_ae_loss_kernel(%arg0: memref<1x128xf32, #tpu.memory_space<vmem>>, %arg1: memref<2x128xi32, #tpu.memory_space<vmem>>, %arg2: memref<2xf32, #tpu.memory_space<smem>>, %arg3: memref<2xf32, #tpu.memory_space<smem>>) attributes {dimension_semantics = [], scalar_prefetch = 0 : i64, scratch_operands = 0 : i64, tpu.core_type = #tpu.core_type<tc>} {
    %0 = tpu.iota {dimensions = array<i32: 0>} : vector<12x128xi32>
    %cst = arith.constant 0.000000e+00 : f32
    %1 = vector.broadcast %cst : f32 to vector<12x1xf32>
    %cst_0 = arith.constant 0.000000e+00 : f32
    %2 = vector.broadcast %cst_0 : f32 to vector<12x1xf32>
    %cst_1 = arith.constant 0.000000e+00 : f32
    %3 = vector.broadcast %cst_1 : f32 to vector<12x1xf32>
    %c0 = arith.constant 0 : index
    %c0_2 = arith.constant 0 : index
    %4 = vector.load %arg0[%c0, %c0_2] : memref<1x128xf32, #tpu.memory_space<vmem>>, vector<1x128xf32>
    %c0_3 = arith.constant 0 : index
    %c0_4 = arith.constant 0 : index
    %5 = vector.load %arg1[%c0_3, %c0_4] : memref<2x128xi32, #tpu.memory_space<vmem>>, vector<1x128xi32>
    %c1 = arith.constant 1 : index
    %c0_5 = arith.constant 0 : index
    %6 = vector.load %arg1[%c1, %c0_5] : memref<2x128xi32, #tpu.memory_space<vmem>>, vector<1x128xi32>
    %c6_i32 = arith.constant 6 : i32
    %7 = vector.broadcast %c6_i32 : i32 to vector<1x128xi32>
    %8 = arith.muli %6, %7 : vector<1x128xi32>
    %9 = arith.addi %8, %5 : vector<1x128xi32>
    %10 = vector.broadcast %9 : vector<1x128xi32> to vector<12x128xi32>
    %11 = arith.cmpi eq, %10, %0 : vector<12x128xi32>
    %cst_6 = arith.constant 0.000000e+00 : f32
    %12 = vector.shape_cast %4 : vector<1x128xf32> to vector<1x128xf32>
    %13 = vector.broadcast %12 : vector<1x128xf32> to vector<12x128xf32>
    %14 = vector.broadcast %cst_6 : f32 to vector<12x128xf32>
    %15 = arith.select %11, %13, %14 : vector<12x128xi1>, vector<12x128xf32>
    %cst_7 = arith.constant 1.000000e+00 : f32
    %cst_8 = arith.constant 0.000000e+00 : f32
    %16 = vector.broadcast %cst_7 : f32 to vector<12x128xf32>
    %17 = vector.broadcast %cst_8 : f32 to vector<12x128xf32>
    %18 = arith.select %11, %16, %17 : vector<12x128xi1>, vector<12x128xf32>
    %cst_9 = arith.constant dense<0.000000e+00> : vector<12xf32>
    %19 = vector.multi_reduction <add>, %18, %cst_9 [1] : vector<12x128xf32> to vector<12xf32>
    %20 = vector.shape_cast %19 : vector<12xf32> to vector<12x1xf32>
    %21 = arith.addf %1, %20 : vector<12x1xf32>
    %cst_10 = arith.constant dense<0.000000e+00> : vector<12xf32>
    %22 = vector.multi_reduction <add>, %15, %cst_10 [1] : vector<12x128xf32> to vector<12xf32>
    %23 = vector.shape_cast %22 : vector<12xf32> to vector<12x1xf32>
    %24 = arith.addf %2, %23 : vector<12x1xf32>
    %25 = vector.broadcast %4 : vector<1x128xf32> to vector<12x128xf32>
    %26 = arith.mulf %15, %25 : vector<12x128xf32>
    %cst_11 = arith.constant dense<0.000000e+00> : vector<12xf32>
    %27 = vector.multi_reduction <add>, %26, %cst_11 [1] : vector<12x128xf32> to vector<12xf32>
    %28 = vector.shape_cast %27 : vector<12xf32> to vector<12x1xf32>
    %29 = arith.addf %3, %28 : vector<12x1xf32>
    %cst_12 = arith.constant 0.000000e+00 : f32
    %30 = vector.broadcast %cst_12 : f32 to vector<12x1xf32>
    %31 = arith.cmpf ogt, %21, %30 : vector<12x1xf32>
    %cst_13 = arith.constant 1.000000e+00 : f32
    %32 = vector.broadcast %cst_13 : f32 to vector<12x1xf32>
    %33 = arith.divf %32, %21 : vector<12x1xf32>
    %cst_14 = arith.constant 0.000000e+00 : f32
    %34 = vector.broadcast %cst_14 : f32 to vector<12x1xf32>
    %35 = arith.select %31, %33, %34 : vector<12x1xi1>, vector<12x1xf32>
    %36 = arith.mulf %24, %35 : vector<12x1xf32>
    %37 = arith.mulf %29, %35 : vector<12x1xf32>
    %38 = arith.mulf %36, %36 : vector<12x1xf32>
    %39 = arith.subf %37, %38 : vector<12x1xf32>
    %cst_15 = arith.constant 0.000000e+00 : f32
    %40 = vector.broadcast %cst_15 : f32 to vector<12x1xf32>
    %41 = arith.maximumf %39, %40 : vector<12x1xf32>
    %42 = tpu.iota {dimensions = array<i32: 0>} : vector<12x12xi32>
    %43 = tpu.iota {dimensions = array<i32: 1>} : vector<12x12xi32>
    %44 = arith.cmpi eq, %42, %43 : vector<12x12xi32>
    %cst_16 = arith.constant 0.000000e+00 : f32
    %45 = vector.shape_cast %36 : vector<12x1xf32> to vector<12x1xf32>
    %46 = vector.broadcast %45 : vector<12x1xf32> to vector<12x12xf32>
    %47 = vector.broadcast %cst_16 : f32 to vector<12x12xf32>
    %48 = arith.select %44, %46, %47 : vector<12x12xi1>, vector<12x12xf32>
    %cst_17 = arith.constant dense<0.000000e+00> : vector<12xf32>
    %49 = vector.multi_reduction <add>, %48, %cst_17 [0] : vector<12x12xf32> to vector<12xf32>
    %50 = vector.shape_cast %49 : vector<12xf32> to vector<1x12xf32>
    %51 = tpu.iota {dimensions = array<i32: 0>} : vector<6x1xi32>
    %52 = tpu.iota {dimensions = array<i32: 1>} : vector<1x6xi32>
    %53 = vector.extract_strided_slice %21 {offsets = [0, 0], sizes = [6, 1], strides = [1, 1]} : vector<12x1xf32> to vector<6x1xf32>
    %54 = vector.extract_strided_slice %36 {offsets = [0, 0], sizes = [6, 1], strides = [1, 1]} : vector<12x1xf32> to vector<6x1xf32>
    %55 = vector.extract_strided_slice %50 {offsets = [0, 0], sizes = [1, 6], strides = [1, 1]} : vector<1x12xf32> to vector<1x6xf32>
    %56 = vector.extract_strided_slice %41 {offsets = [0, 0], sizes = [6, 1], strides = [1, 1]} : vector<12x1xf32> to vector<6x1xf32>
    %57 = vector.shape_cast %56 : vector<6x1xf32> to vector<1x6x1xf32>
    %cst_18 = arith.constant dense<0.000000e+00> : vector<1xf32>
    %58 = vector.multi_reduction <add>, %57, %cst_18 [1, 2] : vector<1x6x1xf32> to vector<1xf32>
    %59 = vector.shape_cast %58 : vector<1xf32> to vector<1x1x1xf32>
    %60 = vector.extract %59[0, 0, 0] : f32 from vector<1x1x1xf32>
    %cst_19 = arith.constant 0.000000e+00 : f32
    %61 = vector.broadcast %cst_19 : f32 to vector<6x1xf32>
    %62 = arith.cmpf ogt, %53, %61 : vector<6x1xf32>
    %c1_i32 = arith.constant 1 : i32
    %63 = vector.broadcast %c1_i32 : i32 to vector<6x1xi32>
    %64 = arith.addi %51, %63 : vector<6x1xi32>
    %c0_i32 = arith.constant 0 : i32
    %65 = vector.broadcast %c0_i32 : i32 to vector<6x1xi32>
    %66 = arith.select %62, %64, %65 : vector<6x1xi1>, vector<6x1xi32>
    %67 = vector.shape_cast %66 : vector<6x1xi32> to vector<1x6x1xi32>
    %cst_20 = arith.constant dense<-2147483648> : vector<1xi32>
    %68 = vector.multi_reduction <maxsi>, %67, %cst_20 [1, 2] : vector<1x6x1xi32> to vector<1xi32>
    %69 = vector.shape_cast %68 : vector<1xi32> to vector<1x1x1xi32>
    %70 = vector.extract %69[0, 0, 0] : i32 from vector<1x1x1xi32>
    %71 = arith.sitofp %70 : i32 to f32
    %cst_21 = arith.constant 1.000000e+00 : f32
    %72 = arith.maximumf %71, %cst_21 : f32
    %73 = arith.divf %60, %72 : f32
    %74 = vector.broadcast %55 : vector<1x6xf32> to vector<6x6xf32>
    %75 = vector.broadcast %54 : vector<6x1xf32> to vector<6x6xf32>
    %76 = arith.subf %74, %75 : vector<6x6xf32>
    %77 = arith.mulf %76, %76 : vector<6x6xf32>
    %cst_22 = arith.constant 0.000000e+00 : f32
    %78 = vector.broadcast %cst_22 : f32 to vector<6x6xf32>
    %79 = arith.subf %78, %77 : vector<6x6xf32>
    %80 = math.exp %79 : vector<6x6xf32>
    %81 = vector.broadcast %70 : i32 to vector<6x1xi32>
    %82 = arith.cmpi slt, %51, %81 : vector<6x1xi32>
    %83 = vector.broadcast %70 : i32 to vector<1x6xi32>
    %84 = arith.cmpi slt, %52, %83 : vector<1x6xi32>
    %85 = vector.broadcast %82 : vector<6x1xi1> to vector<6x6xi1>
    %86 = vector.broadcast %84 : vector<1x6xi1> to vector<6x6xi1>
    %87 = arith.andi %85, %86 : vector<6x6xi1>
    %cst_23 = arith.constant 0.000000e+00 : f32
    %88 = vector.broadcast %cst_23 : f32 to vector<6x6xf32>
    %89 = arith.select %87, %80, %88 : vector<6x6xi1>, vector<6x6xf32>
    %90 = vector.shape_cast %89 : vector<6x6xf32> to vector<1x6x6xf32>
    %cst_24 = arith.constant dense<0.000000e+00> : vector<1xf32>
    %91 = vector.multi_reduction <add>, %90, %cst_24 [1, 2] : vector<1x6x6xf32> to vector<1xf32>
    %92 = vector.shape_cast %91 : vector<1xf32> to vector<1x1x1xf32>
    %93 = vector.extract %92[0, 0, 0] : f32 from vector<1x1x1xf32>
    %94 = arith.subf %93, %71 : f32
    %cst_25 = arith.constant 1.000000e+00 : f32
    %95 = arith.subf %71, %cst_25 : f32
    %96 = arith.mulf %95, %71 : f32
    %cst_26 = arith.constant 1.000000e+00 : f32
    %97 = arith.maximumf %96, %cst_26 : f32
    %c2_i32 = arith.constant 2 : i32
    %98 = arith.cmpi sge, %70, %c2_i32 : i32
    %99 = arith.divf %94, %97 : f32
    %cst_27 = arith.constant 5.000000e-01 : f32
    %100 = arith.mulf %99, %cst_27 : f32
    %cst_28 = arith.constant 0.000000e+00 : f32
    %101 = arith.select %98, %100, %cst_28 : f32
    %c0_29 = arith.constant 0 : index
    %102 = memref.load %arg2[%c0_29] : memref<2xf32, #tpu.memory_space<smem>>
    memref.store %101, %arg2[%c0_29] : memref<2xf32, #tpu.memory_space<smem>>
    %c0_30 = arith.constant 0 : index
    %103 = memref.load %arg3[%c0_30] : memref<2xf32, #tpu.memory_space<smem>>
    memref.store %73, %arg3[%c0_30] : memref<2xf32, #tpu.memory_space<smem>>
    %104 = vector.extract_strided_slice %21 {offsets = [6, 0], sizes = [6, 1], strides = [1, 1]} : vector<12x1xf32> to vector<6x1xf32>
    %105 = vector.extract_strided_slice %36 {offsets = [6, 0], sizes = [6, 1], strides = [1, 1]} : vector<12x1xf32> to vector<6x1xf32>
    %106 = vector.extract_strided_slice %50 {offsets = [0, 6], sizes = [1, 6], strides = [1, 1]} : vector<1x12xf32> to vector<1x6xf32>
    %107 = vector.extract_strided_slice %41 {offsets = [6, 0], sizes = [6, 1], strides = [1, 1]} : vector<12x1xf32> to vector<6x1xf32>
    %108 = vector.shape_cast %107 : vector<6x1xf32> to vector<1x6x1xf32>
    %cst_31 = arith.constant dense<0.000000e+00> : vector<1xf32>
    %109 = vector.multi_reduction <add>, %108, %cst_31 [1, 2] : vector<1x6x1xf32> to vector<1xf32>
    %110 = vector.shape_cast %109 : vector<1xf32> to vector<1x1x1xf32>
    %111 = vector.extract %110[0, 0, 0] : f32 from vector<1x1x1xf32>
    %cst_32 = arith.constant 0.000000e+00 : f32
    %112 = vector.broadcast %cst_32 : f32 to vector<6x1xf32>
    %113 = arith.cmpf ogt, %104, %112 : vector<6x1xf32>
    %c1_i32_33 = arith.constant 1 : i32
    %114 = vector.broadcast %c1_i32_33 : i32 to vector<6x1xi32>
    %115 = arith.addi %51, %114 : vector<6x1xi32>
    %c0_i32_34 = arith.constant 0 : i32
    %116 = vector.broadcast %c0_i32_34 : i32 to vector<6x1xi32>
    %117 = arith.select %113, %115, %116 : vector<6x1xi1>, vector<6x1xi32>
    %118 = vector.shape_cast %117 : vector<6x1xi32> to vector<1x6x1xi32>
    %cst_35 = arith.constant dense<-2147483648> : vector<1xi32>
    %119 = vector.multi_reduction <maxsi>, %118, %cst_35 [1, 2] : vector<1x6x1xi32> to vector<1xi32>
    %120 = vector.shape_cast %119 : vector<1xi32> to vector<1x1x1xi32>
    %121 = vector.extract %120[0, 0, 0] : i32 from vector<1x1x1xi32>
    %122 = arith.sitofp %121 : i32 to f32
    %cst_36 = arith.constant 1.000000e+00 : f32
    %123 = arith.maximumf %122, %cst_36 : f32
    %124 = arith.divf %111, %123 : f32
    %125 = vector.broadcast %106 : vector<1x6xf32> to vector<6x6xf32>
    %126 = vector.broadcast %105 : vector<6x1xf32> to vector<6x6xf32>
    %127 = arith.subf %125, %126 : vector<6x6xf32>
    %128 = arith.mulf %127, %127 : vector<6x6xf32>
    %cst_37 = arith.constant 0.000000e+00 : f32
    %129 = vector.broadcast %cst_37 : f32 to vector<6x6xf32>
    %130 = arith.subf %129, %128 : vector<6x6xf32>
    %131 = math.exp %130 : vector<6x6xf32>
    %132 = vector.broadcast %121 : i32 to vector<6x1xi32>
    %133 = arith.cmpi slt, %51, %132 : vector<6x1xi32>
    %134 = vector.broadcast %121 : i32 to vector<1x6xi32>
    %135 = arith.cmpi slt, %52, %134 : vector<1x6xi32>
    %136 = vector.broadcast %133 : vector<6x1xi1> to vector<6x6xi1>
    %137 = vector.broadcast %135 : vector<1x6xi1> to vector<6x6xi1>
    %138 = arith.andi %136, %137 : vector<6x6xi1>
    %cst_38 = arith.constant 0.000000e+00 : f32
    %139 = vector.broadcast %cst_38 : f32 to vector<6x6xf32>
    %140 = arith.select %138, %131, %139 : vector<6x6xi1>, vector<6x6xf32>
    %141 = vector.shape_cast %140 : vector<6x6xf32> to vector<1x6x6xf32>
    %cst_39 = arith.constant dense<0.000000e+00> : vector<1xf32>
    %142 = vector.multi_reduction <add>, %141, %cst_39 [1, 2] : vector<1x6x6xf32> to vector<1xf32>
    %143 = vector.shape_cast %142 : vector<1xf32> to vector<1x1x1xf32>
    %144 = vector.extract %143[0, 0, 0] : f32 from vector<1x1x1xf32>
    %145 = arith.subf %144, %122 : f32
    %cst_40 = arith.constant 1.000000e+00 : f32
    %146 = arith.subf %122, %cst_40 : f32
    %147 = arith.mulf %146, %122 : f32
    %cst_41 = arith.constant 1.000000e+00 : f32
    %148 = arith.maximumf %147, %cst_41 : f32
    %c2_i32_42 = arith.constant 2 : i32
    %149 = arith.cmpi sge, %121, %c2_i32_42 : i32
    %150 = arith.divf %145, %148 : f32
    %cst_43 = arith.constant 5.000000e-01 : f32
    %151 = arith.mulf %150, %cst_43 : f32
    %cst_44 = arith.constant 0.000000e+00 : f32
    %152 = arith.select %149, %151, %cst_44 : f32
    %c1_45 = arith.constant 1 : index
    %153 = memref.load %arg2[%c1_45] : memref<2xf32, #tpu.memory_space<smem>>
    memref.store %152, %arg2[%c1_45] : memref<2xf32, #tpu.memory_space<smem>>
    %c1_46 = arith.constant 1 : index
    %154 = memref.load %arg3[%c1_46] : memref<2xf32, #tpu.memory_space<smem>>
    memref.store %124, %arg3[%c1_46] : memref<2xf32, #tpu.memory_space<smem>>
    return
  }
}

</mosaic_0001>

<bundles_post_ra>
// kernel: tpu_custom_call.1
= control target key start
LH: loop header
LB: loop body
LE: loop exit
PB: predicated region body
PF: predicated region fallthrough
CT: control target
= control target key end

     0   :  { %9 = vsyncpa [#allocation3], 0  ;;  %s538_s0 = inlined_call_operand.hbm [shape: f32[1,128], index: 0, kind: input, shape index: {}]   ;;  %s539_s1 = inlined_call_operand.vmem [shape: s32[2,128], index: 1, kind: input, shape index: {}]   ;;  %s540_s2 = inlined_call_operand.hbm [shape: f32[2], index: 2, kind: output, shape index: {0}]   ;;  %s541_s3 = inlined_call_operand.hbm [shape: f32[2], index: 3, kind: output, shape index: {1}]  }
   0x1   :  { %10 = vsyncpa [#allocation4], 0 }
   0x2   :  { %11 = vsyncpa [#allocation7], 0  ;;  %s403_s12 = smov [#allocation2]   ;;  %s355_s16 = scalar_lea.hbm %s538_s0, 16 }
   0x3   :  { %s18_s13 = sshll.u32 %s403_s12, 4  ;;  %p356_p0 = scmp.ne.s32.totalorder %s538_s0, %s355_s16  ;;  %s19_s13 = int_to_ptr.vmem [resolvable:$true] %s18_s13 }
   0x4   :  { %p359_p1 = scmp.lt.u32.totalorder %s355_s16, %s538_s0 }
   0x6   :  { %p361_p2 = pnand %p359_p1, %p356_p0 }
   0x8   :  { %364 = shalt.err (!%p361_p2)
}
   0x9   :  { %s365_s21 = scalar_lea.vmem %s19_s13, 16  ;;  %s369_s22 = scalar_lea.vmem %s19_s13, 32 }
   0xa   :  { %p366_p3 = scmp.ne.s32.totalorder %s19_s13, %s365_s21  ;;  %p370_p4 = scmp.lt.s32.totalorder %s19_s13, %s19_s13 }
   0xb   :  { %p371_p5 = scmp.lt.s32.totalorder %s369_s22, %s365_s21 }
   0xd   :  { %p372_p6 = por %p371_p5, %p370_p4 }
   0xf   :  { %p373_p7 = pnand %p372_p6, %p366_p3 }
  0x11   :  { %376 = shalt.err (!%p373_p7)
}
  0x12   :  { %21 = dma.hbm_to_vmem [thread:$0]  %s538_s0, 16, %s19_s13, [#allocation3]  }
  0x13   :  { %397 = dma.done.wait [#allocation3], 16  }
  0x14   :  { %398 = vsyncadd [#allocation3], 4294967280  ;;  %v27_v0 = vlaneseq  ;;  %v31_v2 = vld [vmem:[%s539_s1] sm:$0x1]  ;;  %v32_v3 = vld [vmem:[%s539_s1 + $0x1] sm:$0x1] }
  0x15   :  { %v33_v4 = vmul.u32 6, %v32_v3  ;;  %v310_v9 = vld [vmem:[#allocation2] ss:$0 sm:$0xff]  ;;  %v404_v10 = vmov 0.0   ;;  %vm53_vm2 = vcmask 1043456   ;;  %vm201_vm4 = vcmask 7174  }
  0x16   :  { %v441_v1 = vshrl.u32 %v27_v0, 7  ;;  %vm203_vm5 = vcmask 3072   ;;  %v465_v33 = vand.u32 127, %v27_v0  ;;  %vm99_vm9 = vcmask 97280   ;;  %s405_s30 = smov 1.0   ;;  %s406_s5 = smov 122  }
  0x17   :  { %v34_v6 = vadd.s32 %v33_v4, %v31_v2  ;;  %vm110_vm11 = vcmask 5120   ;;  %vm101_vm12 = vcmask 93184   ;;  %vm183_vm13 = vcmask 1041408   ;;  %s377_s24 = scalar_lea.hbm %s541_s3, 16 }
  0x18   :  { %v37_v5 = vsub.s32 0, %v441_v1  ;;  %v29_v7 = vadd.s32 8, %v441_v1  ;;  %v453_v20 = vadd.s32 1, %v441_v1  ;;  %vm95_vm8 = vcmp.eq.s32.totalorder %v441_v1, %v465_v33  ;;  %p378_p9 = scmp.ne.s32.totalorder %s541_s3, %s377_s24  ;;  %p381_p10 = scmp.lt.u32.totalorder %s377_s24, %s541_s3 }
  0x19   :  { %vm123_vm14 = vcmask 1045504  }
  0x1a   :  { %v38_v8 = vrot.slane %v34_v6, %v37_v5  ;;  %v198_v22 = vrot.slane %v453_v20, 2  ;;  %vm96_vm10 = vcmp.eq.s32.totalorder %v29_v7, %v465_v33  ;;  %p383_p11 = pnand %p381_p10, %p378_p9 }
  0x1c   :  { %vm39_vm0 = vcmp.eq.s32.totalorder %v38_v8, %v441_v1  ;;  %vm40_vm1 = vcmp.eq.s32.totalorder %v38_v8, %v29_v7 }
  0x1d   :  { %v49_v11 = vsel %vm39_vm0, 1.0, %v404_v10  ;;  %v47_v12 = vsel %vm39_vm0, %v310_v9, 0.0  ;;  %v50_v14 = vsel %vm40_vm1, 1.0, %v404_v10  ;;  %v48_v16 = vsel %vm40_vm1, %v310_v9, 0.0 }
  0x1e   :  { %51 = vadd.xlane.f32.xlu0 %v49_v11  ;;  %v66_v13 = vmul.f32 %v310_v9, %v47_v12  ;;  %v54_v15 = vsel %vm53_vm2, %v50_v14, 0.0  ;;  %v61_v17 = vsel %vm53_vm2, %v48_v16, 0.0  ;;  %v67_v18 = vmul.f32 %v310_v9, %v48_v16 }
  0x20   :  { %68 = vadd.xlane.f32.xlu1 %v66_v13  ;;  %v70_v19 = vsel %vm53_vm2, %v67_v18, 0.0 }
  0x22   :  { %59 = vadd.xlane.f32.xlu0 %v47_v12 }
  0x24   :  { %55 = vadd.xlane.f32.xlu1 %v54_v15 }
  0x28   :  { %62 = vadd.xlane.f32.xlu1 %v61_v17 }
  0xab   :  { %v455_v21 = vpop.xlane.xlu0 %51 }
  0xac   :  { %339 = vrcp.f32 %v455_v21  ;;  %vm75_vm3 = vcmp.gt.f32.partialorder %v455_v21, 0.0 }
  0xad   :  { %v69_v23 = vpop.xlane.xlu1 %68  ;;  %v199_v24 = vsel %vm75_vm3, %v198_v22, 0  ;;  %v122_v7 = vsel %vm75_vm3, %v453_v20, 0 }
  0xae   :  { %v202_v27 = vsel %vm201_vm4, %v199_v24, 2147483648  ;;  %v124_v8 = vsel %vm123_vm14, %v122_v7, 2147483648 }
  0xaf   :  { %v60_v29 = vpop.xlane.xlu0 %59  ;;  %v125_v9 = vrot.slane %v124_v8, 4 }
  0xb1   :  { %v56_v25 = vpop.xlane.xlu1 %55  ;;  %vm126_vm15 = vcmp.gt.s32.totalorder %v124_v8, %v125_v9 }
  0xb2   :  { %vm76_vm6 = vcmp.gt.f32.partialorder %v56_v25, 0.0  ;;  %341 = vrcp.f32 %v56_v25  ;;  %v127_v11 = vsel %vm126_vm15, %v124_v8, %v125_v9 }
  0xb3   :  { %v200_v26 = vsel %vm76_vm6, %v198_v22, 0  ;;  %v128_v15 = vrot.slane %v127_v11, 2 }
  0xb4   :  { %v204_v28 = vsel %vm203_vm5, %v200_v26, 2147483648  ;;  %vm155_vm5 = vcmask 46080  }
  0xb5   :  { %vm205_vm7 = vcmp.gt.s32.totalorder %v202_v27, %v204_v28  ;;  %v63_v39 = vpop.xlane.xlu1 %62  ;;  %vm129_vm1 = vcmp.gt.s32.totalorder %v127_v11, %v128_v15 }
  0xb6   :  { %v340_v30 = vpop.eup %339  ;;  %v206_v31 = vsel %vm205_vm7, %v202_v27, %v204_v28 }
  0xb7   :  { %v81_v32 = vsel %vm75_vm3, %v340_v30, 0.0  ;;  %v208_v34 = vshra.s32 %v206_v31, 16  ;;  %v207_v10 = vand.u32 65535, %v206_v31 }
  0xb8   :  { %v83_v35 = vmul.f32 %v81_v32, %v60_v29  ;;  %v85_v37 = vmul.f32 %v81_v32, %v69_v23 }
  0xb9   :  { %v210_v36 = vcvt.s32.f32 %v208_v34  ;;  %v209_v13 = vcvt.s32.f32 %v207_v10 }
  0xba   :  { %v87_v38 = vmul.f32 %v83_v35, %v83_v35  ;;  %v97_v43 = vsel %vm95_vm8, %v83_v35, 0.0 }
  0xbb   :  { %211 = vmax.xlane.f32.xlu1 %v210_v36  ;;  %v100_v48 = vsel %vm99_vm9, %v97_v43, 0.0 }
  0xbc   :  { %v342_v40 = vpop.eup %341  ;;  %v89_v41 = vsub.f32 %v85_v37, %v87_v38 }
  0xbd   :  { %v82_v42 = vsel %vm76_vm6, %v342_v40, 0.0 }
  0xbe   :  { %v84_v44 = vmul.f32 %v82_v42, %v63_v39  ;;  %v471_v45 = vmax.f32 %v89_v41, 0.0 }
  0xc0   :  { %v98_v46 = vsel %vm96_vm10, %v84_v44, 0.0  ;;  %v111_v47 = vsel %vm110_vm11, %v471_v45, 0.0  ;;  %v88_v20 = vmul.f32 %v84_v44, %v84_v44  ;;  %v184_v29 = vrot.slane %v471_v45, 6 }
  0xc1   :  { %v102_v49 = vsel %vm101_vm12, %v98_v46, 0.0  ;;  %112 = vadd.xlane.f32.xlu0 %v111_v47 }
  0xc2   :  { %v103_v50 = vadd.f32 %v102_v49, %v100_v48 }
  0xc4   :  { %v104_v51 = vrot.slane %v103_v50, 4 }
  0xc5   :  { %71 = vadd.xlane.f32.xlu0 %v70_v19  ;;  %v130_v19 = vsel %vm129_vm1, %v127_v11, %v128_v15 }
  0xc6   :  { %v105_v52 = vadd.f32 %v104_v51, %v103_v50  ;;  %v131_v24 = vrot.slane %v130_v19, 1 }
  0xc8   :  { %v106_v53 = vrot.slane %v105_v52, 2  ;;  %vm132_vm2 = vcmp.gt.s32.totalorder %v130_v19, %v131_v24 }
  0xc9   :  { %v133_v32 = vsel %vm132_vm2, %v130_v19, %v131_v24 }
  0xca   :  { %v107_v54 = vadd.f32 %v106_v53, %v105_v52 }
  0xcc   :  { %v108_v55 = vrot.slane %v107_v54, 1 }
  0xce   :  { %v109_v56 = vadd.f32 %v108_v55, %v107_v54 }
  0xd0   :  { %v141_v57 = vsub.f32 %v109_v56, %v83_v35  ;;  %v237_v58 = vsub.f32 %v109_v56, %v84_v44 }
  0xd2   :  { %v142_v59 = vmul.f32 %v141_v57, %v141_v57  ;;  %v238_v60 = vmul.f32 %v237_v58, %v237_v58 }
  0xd4   :  { %v143_v61 = vsub.f32 0.0, %v142_v59  ;;  %v239_v62 = vsub.f32 0.0, %v238_v60 }
  0xd6   :  { %v144_v63 = vmul.f32 1.442695, %v143_v61  ;;  %v240_v0 = vmul.f32 1.442695, %v239_v62 }
  0xd8   :  { %343 = vpow2.f32 %v144_v63 }
  0xd9   :  { %345 = vpow2.f32 %v240_v0 }
  0xe2   :  { %v344_v2 = vpop.eup %343 }
  0xe3   :  { %v346_v3 = vpop.eup %345  ;;  %v252_v4 = vrot.slane %v344_v2, 6 }
  0xe4   :  { %v253_v5 = vrot.slane %v346_v3, 6 }
  0xe6   :  { %v254_v6 = vsel %vm183_vm13, %v252_v4, %v253_v5 }
 0x148   :  { %v212_v12 = vpop.xlane.xlu1 %211 }
 0x149   :  { %vm213_vm0 = vcmp.eq.f32.partialorder %v210_v36, %v212_v12 }
 0x14a   :  { %v214_v14 = vsel %vm213_vm0, %v209_v13, -inf }
 0x14b   :  { %215 = vmax.xlane.f32.xlu0 %v214_v14 }
 0x14e   :  { %v113_v16 = vpop.xlane.xlu0 %112 }
 0x14f   :  { %v114_v17 = vrot.slane %v113_v16, 4 }
 0x151   :  { %v115_v18 = vadd.f32 %v114_v17, %v113_v16 }
 0x152   :  { %v72_v22 = vpop.xlane.xlu0 %71 }
 0x153   :  { %v116_v23 = vrot.slane %v115_v18, 2  ;;  %v86_v21 = vmul.f32 %v82_v42, %v72_v22  ;;  %v218_v42 = vcvt.f32.s32 %v212_v12 }
 0x155   :  { %v90_v25 = vsub.f32 %v86_v21, %v88_v20  ;;  %v117_v26 = vadd.f32 %v116_v23, %v115_v18  ;;  %v219_v44 = vshll.u32 %v218_v42, 16 }
 0x157   :  { %v92_v27 = vmax.f32 %v90_v25, 0.0  ;;  %v118_v28 = vrot.slane %v117_v26, 1 }
 0x159   :  { %v185_v30 = vrot.slane %v92_v27, 6  ;;  %v119_v31 = vadd.f32 %v118_v28, %v117_v26 }
 0x15b   :  { %313 = vpush %v119_v31  ;;  %v186_v34 = vsel %vm183_vm13, %v184_v29, %v185_v30 }
 0x15c   :  { %315 = vpush %v133_v32  ;;  %v188_v35 = vsel %vm110_vm11, %v186_v34, 0.0 }
 0x15d   :  { %189 = vadd.xlane.f32.xlu0 %v188_v35 }
 0x18c   :  { %s314_s0 = spop %313 }
 0x18d   :  { %s482_s1 = spop %315 }
 0x18e   :  { %s485_s29 = scvt.s32.f32 %s482_s1  ;;  %v146_v36 = vstv %s482_s1  ;;  %p170_p8 = scmp.ge.s32.totalorder %s482_s1, 2 }
 0x18f   :  { %vm147_vm3 = vcmp.lt.s32.totalorder %v441_v1, %v146_v36  ;;  %vm148_vm4 = vcmp.lt.s32.totalorder %v465_v33, %v146_v36 }
 0x190   :  { %vm153_vm6 = vmand %vm147_vm3, %vm148_vm4  ;;  %s136_s4 = smax.f32 %s405_s30, %s485_s29  ;;  %s311_s8 = sadd.f32 -1.0, %s485_s29 }
 0x191   :  { %v154_v37 = vsel %vm153_vm6, %v344_v2, 0.0  ;;  %v137_v38 = vstv %s136_s4 }
 0x192   :  { %v156_v39 = vsel %vm155_vm5, %v154_v37, 0.0  ;;  %347 = vrcp.f32 %v137_v38  ;;  %s168_s9 = smul.f32 %s311_s8, %s485_s29 }
 0x193   :  { %157 = vadd.xlane.f32.xlu1 %v156_v39 }
 0x194   :  { %s169_s10 = smax.f32 %s405_s30, %s168_s9 }
 0x195   :  { %v171_v53 = vstv %s169_s10 }
 0x196   :  { %349 = vrcp.f32 %v171_v53 }
 0x19c   :  { %v348_v40 = vpop.eup %347 }
 0x19d   :  { %317 = vpush %v348_v40 }
 0x1a0   :  { %v350_v2 = vpop.eup %349 }
 0x1a4   :  { %255 = vrot.lane.b32.xlu1 %v254_v6, %s406_s5 }
 0x1ce   :  { %s318_s6 = spop %317 }
 0x1cf   :  { %s140_s7 = smul.f32 %s318_s6, %s314_s0 }
 0x1d1   :  { %180 = sst [smem:[#allocation6]] %s140_s7 }
 0x1d8   :  { %v216_v41 = vpop.xlane.xlu0 %215 }
 0x1d9   :  { %v217_v43 = vcvt.f32.s32 %v216_v41 }
 0x1db   :  { %v220_v45 = vadd.s32 %v219_v44, %v217_v43 }
 0x1dd   :  { %v221_v46 = vrot.slane %v220_v45, 4 }
 0x1df   :  { %vm222_vm7 = vcmp.gt.s32.totalorder %v220_v45, %v221_v46 }
 0x1e0   :  { %v223_v49 = vsel %vm222_vm7, %v220_v45, %v221_v46 }
 0x1e1   :  { %v224_v51 = vrot.slane %v223_v49, 2 }
 0x1e3   :  { %vm225_vm8 = vcmp.gt.s32.totalorder %v223_v49, %v224_v51 }
 0x1e4   :  { %v226_v59 = vsel %vm225_vm8, %v223_v49, %v224_v51 }
 0x1e5   :  { %v227_v61 = vrot.slane %v226_v59, 1 }
 0x1e7   :  { %vm228_vm9 = vcmp.gt.s32.totalorder %v226_v59, %v227_v61 }
 0x1e8   :  { %v229_v4 = vsel %vm228_vm9, %v226_v59, %v227_v61 }
 0x1ea   :  { %v190_v47 = vpop.xlane.xlu0 %189 }
 0x1eb   :  { %v191_v48 = vrot.slane %v190_v47, 4 }
 0x1ed   :  { %v192_v50 = vadd.f32 %v191_v48, %v190_v47 }
 0x1ef   :  { %v193_v54 = vrot.slane %v192_v50, 2 }
 0x1f1   :  { %v194_v58 = vadd.f32 %v193_v54, %v192_v50 }
 0x1f3   :  { %v195_v63 = vrot.slane %v194_v58, 1 }
 0x1f5   :  { %v196_v3 = vadd.f32 %v195_v63, %v194_v58 }
 0x220   :  { %v158_v52 = vpop.xlane.xlu1 %157 }
 0x221   :  { %v159_v55 = vrot.slane %v158_v52, 4 }
 0x223   :  { %v160_v56 = vadd.f32 %v159_v55, %v158_v52 }
 0x224   :  { %v256_v6 = vpop.permute.xlu1 %255 }
 0x225   :  { %v161_v57 = vrot.slane %v160_v56, 2 }
 0x227   :  { %v162_v60 = vadd.f32 %v161_v57, %v160_v56 }
 0x229   :  { %v163_v62 = vrot.slane %v162_v60, 1 }
 0x22b   :  { %v164_v0 = vadd.f32 %v163_v62, %v162_v60 }
 0x22d   :  { %319 = vpush %v164_v0 }
 0x22e   :  { %321 = vpush %v350_v2 }
 0x22f   :  { %323 = vpush %v196_v3 }
 0x230   :  { %325 = vpush %v229_v4 }
 0x25e   :  { %s320_s11 = spop %319 }
 0x25f   :  { %s166_s12 = ssub.f32 %s320_s11, %s485_s29  ;;  %s322_s13 = spop %321 }
 0x260   :  { %s324_s14 = spop %323 }
 0x261   :  { %s174_s15 = smul.f32 %s322_s13, %s166_s12  ;;  %s497_s16 = spop %325 }
 0x262   :  { %s500_s17 = scvt.s32.f32 %s497_s16  ;;  %v242_v5 = vstv %s497_s16 }
 0x263   :  { %s175_s18 = smul.f32 0.5, %s174_s15  ;;  %vm243_vm10 = vcmp.lt.s32.totalorder %v441_v1, %v242_v5  ;;  %vm244_vm11 = vcmp.lt.s32.totalorder %v465_v33, %v242_v5 }
 0x264   :  { %vm249_vm12 = vmand %vm243_vm10, %vm244_vm11  ;;  %s232_s19 = smax.f32 %s405_s30, %s500_s17 }
 0x265   :  { %s543_s18 = smov (!%p170_p8, %s175_s18), 0.0  ;;  %v258_v7 = vsel %vm249_vm12, %v256_v6, 0.0  ;;  %v233_v8 = vstv %s232_s19 }
 0x266   :  { %v259_v9 = vsel %vm155_vm5, %v258_v7, 0.0  ;;  %351 = vrcp.f32 %v233_v8  ;;  %178 = sst [smem:[#allocation5]] %s543_s18 }
 0x267   :  { %260 = vadd.xlane.f32.xlu0 %v259_v9 }
 0x270   :  { %v352_v10 = vpop.eup %351 }
 0x271   :  { %327 = vpush %v352_v10 }
 0x2a2   :  { %s328_s20 = spop %327 }
 0x2a3   :  { %s236_s21 = smul.f32 %s328_s20, %s324_s14 }
 0x2a5   :  { %283 = sst [smem:[#allocation6 + $0x1]] %s236_s21 }
 0x2a6   :  { %386 = shalt.err (!%p383_p11)
}
 0x2a7   :  { %s407_s0 = smov [#allocation6]   ;;  %s312_s4 = sadd.f32 -1.0, %s500_s17 }
 0x2a8   :  { %299 = dma.smem_to_hbm %s407_s0, 16, %s541_s3, [#allocation7]  }
 0x2a9   :  { %s271_s5 = smul.f32 %s312_s4, %s500_s17  ;;  %p273_p12 = scmp.ge.s32.totalorder %s497_s16, 2 }
 0x2aa   :  { %s387_s12 = scalar_lea.hbm %s540_s2, 16 }
 0x2ab   :  { %s272_s6 = smax.f32 %s405_s30, %s271_s5  ;;  %p388_p13 = scmp.ne.s32.totalorder %s540_s2, %s387_s12 }
 0x2ac   :  { %v274_v33 = vstv %s272_s6  ;;  %p391_p0 = scmp.lt.u32.totalorder %s387_s12, %s540_s2 }
 0x2ad   :  { %353 = vrcp.f32 %v274_v33 }
 0x2ae   :  { %p393_p1 = pnand %p391_p0, %p388_p13 }
 0x2b7   :  { %v354_v17 = vpop.eup %353 }
 0x2f4   :  { %v261_v1 = vpop.xlane.xlu0 %260 }
 0x2f5   :  { %v262_v11 = vrot.slane %v261_v1, 4 }
 0x2f7   :  { %v263_v12 = vadd.f32 %v262_v11, %v261_v1 }
 0x2f9   :  { %v264_v13 = vrot.slane %v263_v12, 2 }
 0x2fb   :  { %v265_v14 = vadd.f32 %v264_v13, %v263_v12 }
 0x2fd   :  { %v266_v15 = vrot.slane %v265_v14, 1 }
 0x2ff   :  { %v267_v16 = vadd.f32 %v266_v15, %v265_v14 }
 0x301   :  { %329 = vpush %v267_v16 }
 0x302   :  { %331 = vpush %v354_v17 }
 0x332   :  { %s330_s7 = spop %329 }
 0x333   :  { %s269_s3 = ssub.f32 %s330_s7, %s500_s17  ;;  %s332_s8 = spop %331 }
 0x335   :  { %s277_s9 = smul.f32 %s332_s8, %s269_s3 }
 0x337   :  { %s278_s10 = smul.f32 0.5, %s277_s9 }
 0x339   :  { %s545_s10 = smov (!%p273_p12, %s278_s10), 0.0 }
 0x33a   :  { %281 = sst [smem:[#allocation5 + $0x1]] %s545_s10 }
 0x33b   :  { %396 = shalt.err (!%p393_p1)
}
 0x33c   :  { %s408_s17 = smov [#allocation5]  }
 0x33d   :  { %291 = dma.smem_to_hbm %s408_s17, 16, %s540_s2, [#allocation4]  }
 0x33e   :  { %399 = dma.done.wait [#allocation4], 16  }
 0x33f   :  { %400 = vsyncadd [#allocation4], 4294967280 }
 0x340   :  { %401 = dma.done.wait [#allocation7], 16  }
 0x341   :  { %402 = vsyncadd [#allocation7], 4294967280 }
 0x342   :  { %306 = sfence }
 0x343   :  { %307 = vsyncpa [#allocation3], 1 }
 0x344   :  { %308 = vsyncpa [#allocation4], 1 }
 0x345   :  { %309 = vsyncpa [#allocation7], 1 }

</bundles_post_ra>
